<compile_context>
chip_gen: v7x
topology: tpu7x:2x2x1
jax: 0.10.0
libtpu: 0.0.40
codegen_flags: <defaults>
</compile_context>

<pallas_src>
import functools

import jax
import jax.numpy as jnp
from jax import lax
from jax.experimental import pallas as pl
from jax.experimental.pallas import tpu as pltpu


_TAPS = tuple((dy, dx) for dy in (-1, 0, 1) for dx in (-1, 0, 1))


def _round_up(x, m):
    return -(-x // m) * m


def _stack_taps(src_f32, mask_ref, stack_ref, W):
    """Write the 9 shifted + boundary-masked tap slabs of `src_f32` (f32,
    shape (C, LANES)) into the bf16 stacked-operand scratch `stack_ref`
    (shape (9*C, LANES)).  pltpu.roll runs on the XLU; masks are a resident
    0/1 table (no per-tap index math)."""
    C, LANES = src_f32.shape
    for t, (dy, dx) in enumerate(_TAPS):
        if dy == 0 and dx == 0:
            tap = src_f32
        else:
            off = dy * W + dx
            tap = pltpu.roll(src_f32, (-off) % LANES, axis=1) * mask_ref[t]
        stack_ref[t * C:(t + 1) * C, :] = tap.astype(stack_ref.dtype)


def _double_conv_kernel(x_ref, mask_ref, w1_ref, b1_ref, w2_ref, b2_ref,
                        o_ref, stack1_ref, stack2_ref, *, W):
    # x_ref: (1, Cp_in, LANES) bf16  -> one f32 upcast, rolls/masks in f32.
    x = x_ref[0].astype(jnp.float32)

    # conv1 (one MXU matmul over all 9 taps) -> BN shift -> ReLU
    _stack_taps(x, mask_ref, stack1_ref, W)
    h = jnp.dot(w1_ref[...], stack1_ref[...],
                preferred_element_type=jnp.float32)          # (Cp_mid, LANES)
    h = jnp.maximum(h + b1_ref[...], 0.0)                    # padded rows == 0

    # conv2 -> BN shift -> ReLU
    _stack_taps(h, mask_ref, stack2_ref, W)
    y = jnp.dot(w2_ref[...], stack2_ref[...],
                preferred_element_type=jnp.float32)          # (C_out, LANES)
    y = jnp.maximum(y + b2_ref[...], 0.0)

    o_ref[0] = y.astype(o_ref.dtype)


def double_conv(x_nchw, w1, bn1, w2, bn2, *, eps=1e-5):
    """DoubleConv forward (eval-mode BatchNorm folded into weights + shift).

    x_nchw : (N, C_in, H, W)
    w1     : (C_mid, C_in, 3, 3)   conv1 weight (bias=False)
    bn1    : (gamma, beta, running_mean, running_var), each (C_mid,)
    w2     : (C_out, C_mid, 3, 3)  conv2 weight (bias=False)
    bn2    : (gamma, beta, running_mean, running_var), each (C_out,)
    returns (N, C_out, H, W)
    """
    N, C_in, H, W = x_nchw.shape
    C_mid = w1.shape[0]
    C_out = w2.shape[0]
    HW = H * W

    def fold_bn(gamma, beta, mean, var):
        scale = gamma * lax.rsqrt(var.astype(jnp.float32) + eps)
        shift = beta - mean * scale
        return scale.astype(jnp.float32), shift.astype(jnp.float32)

    s1, sh1 = fold_bn(*bn1)
    s2, sh2 = fold_bn(*bn2)

    # Per-tap channel padding (sublane alignment of the stacked operand).
    Cp_in = _round_up(C_in, 8)
    Cp_mid = _round_up(C_mid, 8)

    def pack_weight(w, scale, ci_pad, co_pad):
        # (co, ci, 3, 3) * scale[o]  ->  (co_pad, 9*ci_pad) bf16, tap-major K.
        co, ci = w.shape[0], w.shape[1]
        w = (w * scale.reshape(-1, 1, 1, 1)).astype(jnp.float32)
        w_t = jnp.transpose(w, (2, 3, 0, 1)).reshape(9, co, ci)
        w_p = jnp.zeros((9, co_pad, ci_pad), jnp.float32).at[:, :co, :ci].set(w_t)
        return (jnp.transpose(w_p, (1, 0, 2))
                   .reshape(co_pad, 9 * ci_pad).astype(jnp.bfloat16))

    w1_p = pack_weight(w1, s1, Cp_in, Cp_mid)          # (Cp_mid, 9*Cp_in)
    w2_p = pack_weight(w2, s2, Cp_mid, C_out)          # (C_out, 9*Cp_mid)
    b1_p = jnp.zeros((Cp_mid, 1), jnp.float32).at[:C_mid, 0].set(sh1)
    b2_p = sh2.reshape(C_out, 1)

    # Fold Nb images onto the lane axis per step; keep the grid a multiple of
    # 2 when possible so both v7x TensorCores stay busy.
    G = 2 if (N % 2 == 0 and N >= 2) else 1
    Nb = N // G
    LANES = Nb * HW

    xp = x_nchw
    if Cp_in > C_in:
        xp = jnp.pad(xp, ((0, 0), (0, Cp_in - C_in), (0, 0), (0, 0)))
    x_flat = (xp.reshape(G, Nb, Cp_in, HW)
                .transpose(0, 2, 1, 3)                 # no-op when Nb == 1
                .reshape(G, Cp_in, LANES)
                .astype(jnp.bfloat16))

    # Precomputed boundary masks (implements zero padding=1), one row per tap,
    # computed per image so cross-image taps are zeroed when Nb > 1.
    lane = jnp.arange(LANES, dtype=jnp.int32)
    hh = (lane % HW) // W
    ww = lane % W
    mask = jnp.stack([
        ((hh + dy >= 0) & (hh + dy < H) & (ww + dx >= 0) & (ww + dx < W))
        for dy, dx in _TAPS
    ]).astype(jnp.float32).reshape(9, 1, LANES)

    flops = int(2 * 9 * N * HW * (C_in * C_mid + C_mid * C_out))
    bytes_accessed = int(
        x_flat.size * 2
        + N * C_out * HW * jnp.dtype(x_nchw.dtype).itemsize
        + (w1_p.size + w2_p.size) * 2
        + (b1_p.size + b2_p.size + mask.size) * 4)

    kernel = functools.partial(_double_conv_kernel, W=W)

    y_flat = pl.pallas_call(
        kernel,
        out_shape=jax.ShapeDtypeStruct((G, C_out, LANES), x_nchw.dtype),
        grid_spec=pltpu.PrefetchScalarGridSpec(
            num_scalar_prefetch=0,
            grid=(G,),
            in_specs=[
                pl.BlockSpec((1, Cp_in, LANES), lambda g: (g, 0, 0)),
                # Resident (constant block index) mask / weights / shifts.
                pl.BlockSpec((9, 1, LANES), lambda g: (0, 0, 0)),
                pl.BlockSpec((Cp_mid, 9 * Cp_in), lambda g: (0, 0)),
                pl.BlockSpec((Cp_mid, 1), lambda g: (0, 0)),
                pl.BlockSpec((C_out, 9 * Cp_mid), lambda g: (0, 0)),
                pl.BlockSpec((C_out, 1), lambda g: (0, 0)),
            ],
            out_specs=pl.BlockSpec((1, C_out, LANES), lambda g: (g, 0, 0)),
            scratch_shapes=[
                pltpu.VMEM((9 * Cp_in, LANES), jnp.bfloat16),
                pltpu.VMEM((9 * Cp_mid, LANES), jnp.bfloat16),
            ],
        ),
        compiler_params=pltpu.CompilerParams(
            dimension_semantics=("parallel",),
            vmem_limit_bytes=32 * 1024 * 1024),
        cost_estimate=pl.CostEstimate(
            flops=flops, transcendentals=0, bytes_accessed=bytes_accessed),
    )(x_flat, mask, w1_p, b1_p, w2_p, b2_p)

    return (y_flat.reshape(G, C_out, Nb, HW)
                  .transpose(0, 2, 1, 3)               # no-op when Nb == 1
                  .reshape(N, C_out, H, W))


if __name__ == "__main__":
    key = jax.random.PRNGKey(0)
    keys = jax.random.split(key, 12)

    N, C_in, C_mid, C_out, H, W = 2, 4, 8, 8, 16, 16

    x = jax.random.normal(keys[0], (N, C_in, H, W), dtype=jnp.float32)

    def conv_init(k, c_out, c_in):
        fan_in = c_in * 9
        bound = 1.0 / (fan_in ** 0.5)
        return jax.random.uniform(k, (c_out, c_in, 3, 3), jnp.float32,
                                  minval=-bound, maxval=bound)

    w1 = conv_init(keys[1], C_mid, C_in)
    w2 = conv_init(keys[2], C_out, C_mid)

    def bn_init(kg, kb, km, kv, c):
        gamma = 1.0 + 0.1 * jax.random.normal(kg, (c,), jnp.float32)
        beta = 0.1 * jax.random.normal(kb, (c,), jnp.float32)
        mean = 0.1 * jax.random.normal(km, (c,), jnp.float32)
        var = jax.random.uniform(kv, (c,), jnp.float32, minval=0.5, maxval=1.5)
        return gamma, beta, mean, var

    bn1 = bn_init(keys[3], keys[4], keys[5], keys[6], C_mid)
    bn2 = bn_init(keys[7], keys[8], keys[9], keys[10], C_out)

    y = double_conv(x, w1, bn1, w2, bn2)
    y = jax.block_until_ready(y)

    # Pure-JAX f32 reference: unfolded BN math + lax conv (NCHW / OIHW).
    def ref_forward(x, w1, bn1, w2, bn2, eps=1e-5):
        def conv_bn_relu(h, w, bn):
            gamma, beta, mean, var = bn
            dn = lax.conv_dimension_numbers(h.shape, w.shape,
                                            ("NCHW", "OIHW", "NCHW"))
            h = lax.conv_general_dilated(h, w, window_strides=(1, 1),
                                         padding=((1, 1), (1, 1)),
                                         dimension_numbers=dn)
            h = ((h - mean.reshape(1, -1, 1, 1))
                 * lax.rsqrt(var.reshape(1, -1, 1, 1) + eps)
                 * gamma.reshape(1, -1, 1, 1)
                 + beta.reshape(1, -1, 1, 1))
            return jnp.maximum(h, 0.0)
        return conv_bn_relu(conv_bn_relu(x, w1, bn1), w2, bn2)

    y_ref = ref_forward(x, w1, bn1, w2, bn2)

    assert y.shape == (N, C_out, H, W)
    # bf16 MXU operands (f32 accumulation) -> compare with bf16-level tolerance.
    assert jnp.allclose(y, y_ref, atol=5e-2, rtol=5e-2), \
        float(jnp.max(jnp.abs(y - y_ref)))

    print("KERNEL_OK")
</pallas_src>

<mosaic_0001>
module attributes {stable_mosaic.version = 11 : i64} {
  func.func @_double_conv_kernel(%arg0: i32, %arg1: memref<1x8x256xbf16, #tpu.memory_space<vmem>>, %arg2: memref<9x1x256xf32, #tpu.memory_space<vmem>>, %arg3: memref<8x72xbf16, #tpu.memory_space<vmem>>, %arg4: memref<8x1xf32, #tpu.memory_space<vmem>>, %arg5: memref<8x72xbf16, #tpu.memory_space<vmem>>, %arg6: memref<8x1xf32, #tpu.memory_space<vmem>>, %arg7: memref<1x8x256xf32, #tpu.memory_space<vmem>>, %arg8: memref<72x256xbf16, #tpu.memory_space<vmem>>, %arg9: memref<72x256xbf16, #tpu.memory_space<vmem>>) attributes {dimension_semantics = [#tpu.dimension_semantics<parallel>], iteration_bounds = array<i64: 2>, scalar_prefetch = 0 : i64, scratch_operands = 2 : i64, tpu.core_type = #tpu.core_type<tc>, window_params = [{transform_indices = @transform_0, window_bounds = array<i64: 1, 8, 256>}, {pipeline_mode = #tpu.pipeline_mode<synchronous>, transform_indices = @transform_1, window_bounds = array<i64: 9, 1, 256>}, {pipeline_mode = #tpu.pipeline_mode<synchronous>, transform_indices = @transform_2, window_bounds = array<i64: 8, 72>}, {pipeline_mode = #tpu.pipeline_mode<synchronous>, transform_indices = @transform_3, window_bounds = array<i64: 8, 1>}, {pipeline_mode = #tpu.pipeline_mode<synchronous>, transform_indices = @transform_4, window_bounds = array<i64: 8, 72>}, {pipeline_mode = #tpu.pipeline_mode<synchronous>, transform_indices = @transform_5, window_bounds = array<i64: 8, 1>}, {transform_indices = @transform_6, window_bounds = array<i64: 1, 8, 256>}]} {
    %c0 = arith.constant 0 : index
    %c0_0 = arith.constant 0 : index
    %c0_1 = arith.constant 0 : index
    %0 = vector.load %arg1[%c0, %c0_0, %c0_1] : memref<1x8x256xbf16, #tpu.memory_space<vmem>>, vector<1x8x256xbf16>
    %1 = vector.shape_cast %0 : vector<1x8x256xbf16> to vector<8x256xbf16>
    %2 = arith.extf %1 : vector<8x256xbf16> to vector<8x256xf32>
    %c17_i32 = arith.constant 17 : i32
    %3 = tpu.dynamic_rotate %2 by %c17_i32 dim 1 : vector<8x256xf32>, i32 -> vector<8x256xf32>
    %c0_2 = arith.constant 0 : index
    %c0_3 = arith.constant 0 : index
    %c0_4 = arith.constant 0 : index
    %4 = vector.load %arg2[%c0_2, %c0_3, %c0_4] : memref<9x1x256xf32, #tpu.memory_space<vmem>>, vector<1x1x256xf32>
    %5 = vector.shape_cast %4 : vector<1x1x256xf32> to vector<1x256xf32>
    %6 = vector.broadcast %5 : vector<1x256xf32> to vector<8x256xf32>
    %7 = arith.mulf %3, %6 : vector<8x256xf32>
    %8 = arith.truncf %7 : vector<8x256xf32> to vector<8x256xbf16>
    %c0_5 = arith.constant 0 : index
    %c0_6 = arith.constant 0 : index
    %9 = vector.load %arg8[%c0_5, %c0_6] : memref<72x256xbf16, #tpu.memory_space<vmem>>, vector<8x256xbf16>
    tpu.vector_store %arg8[%c0_5, %c0_6], %8 {strides = array<i32>} : memref<72x256xbf16, #tpu.memory_space<vmem>>, vector<8x256xbf16>,
    %c16_i32 = arith.constant 16 : i32
    %10 = tpu.dynamic_rotate %2 by %c16_i32 dim 1 : vector<8x256xf32>, i32 -> vector<8x256xf32>
    %c1 = arith.constant 1 : index
    %c0_7 = arith.constant 0 : index
    %c0_8 = arith.constant 0 : index
    %11 = vector.load %arg2[%c1, %c0_7, %c0_8] : memref<9x1x256xf32, #tpu.memory_space<vmem>>, vector<1x1x256xf32>
    %12 = vector.shape_cast %11 : vector<1x1x256xf32> to vector<1x256xf32>
    %13 = vector.broadcast %12 : vector<1x256xf32> to vector<8x256xf32>
    %14 = arith.mulf %10, %13 : vector<8x256xf32>
    %15 = arith.truncf %14 : vector<8x256xf32> to vector<8x256xbf16>
    %c8 = arith.constant 8 : index
    %c0_9 = arith.constant 0 : index
    %16 = vector.load %arg8[%c8, %c0_9] : memref<72x256xbf16, #tpu.memory_space<vmem>>, vector<8x256xbf16>
    tpu.vector_store %arg8[%c8, %c0_9], %15 {strides = array<i32>} : memref<72x256xbf16, #tpu.memory_space<vmem>>, vector<8x256xbf16>,
    %c15_i32 = arith.constant 15 : i32
    %17 = tpu.dynamic_rotate %2 by %c15_i32 dim 1 : vector<8x256xf32>, i32 -> vector<8x256xf32>
    %c2 = arith.constant 2 : index
    %c0_10 = arith.constant 0 : index
    %c0_11 = arith.constant 0 : index
    %18 = vector.load %arg2[%c2, %c0_10, %c0_11] : memref<9x1x256xf32, #tpu.memory_space<vmem>>, vector<1x1x256xf32>
    %19 = vector.shape_cast %18 : vector<1x1x256xf32> to vector<1x256xf32>
    %20 = vector.broadcast %19 : vector<1x256xf32> to vector<8x256xf32>
    %21 = arith.mulf %17, %20 : vector<8x256xf32>
    %22 = arith.truncf %21 : vector<8x256xf32> to vector<8x256xbf16>
    %c16 = arith.constant 16 : index
    %c0_12 = arith.constant 0 : index
    %23 = vector.load %arg8[%c16, %c0_12] : memref<72x256xbf16, #tpu.memory_space<vmem>>, vector<8x256xbf16>
    tpu.vector_store %arg8[%c16, %c0_12], %22 {strides = array<i32>} : memref<72x256xbf16, #tpu.memory_space<vmem>>, vector<8x256xbf16>,
    %c1_i32 = arith.constant 1 : i32
    %24 = tpu.dynamic_rotate %2 by %c1_i32 dim 1 : vector<8x256xf32>, i32 -> vector<8x256xf32>
    %c3 = arith.constant 3 : index
    %c0_13 = arith.constant 0 : index
    %c0_14 = arith.constant 0 : index
    %25 = vector.load %arg2[%c3, %c0_13, %c0_14] : memref<9x1x256xf32, #tpu.memory_space<vmem>>, vector<1x1x256xf32>
    %26 = vector.shape_cast %25 : vector<1x1x256xf32> to vector<1x256xf32>
    %27 = vector.broadcast %26 : vector<1x256xf32> to vector<8x256xf32>
    %28 = arith.mulf %24, %27 : vector<8x256xf32>
    %29 = arith.truncf %28 : vector<8x256xf32> to vector<8x256xbf16>
    %c24 = arith.constant 24 : index
    %c0_15 = arith.constant 0 : index
    %30 = vector.load %arg8[%c24, %c0_15] : memref<72x256xbf16, #tpu.memory_space<vmem>>, vector<8x256xbf16>
    tpu.vector_store %arg8[%c24, %c0_15], %29 {strides = array<i32>} : memref<72x256xbf16, #tpu.memory_space<vmem>>, vector<8x256xbf16>,
    %31 = arith.truncf %2 : vector<8x256xf32> to vector<8x256xbf16>
    %c32 = arith.constant 32 : index
    %c0_16 = arith.constant 0 : index
    %32 = vector.load %arg8[%c32, %c0_16] : memref<72x256xbf16, #tpu.memory_space<vmem>>, vector<8x256xbf16>
    tpu.vector_store %arg8[%c32, %c0_16], %31 {strides = array<i32>} : memref<72x256xbf16, #tpu.memory_space<vmem>>, vector<8x256xbf16>,
    %c255_i32 = arith.constant 255 : i32
    %33 = tpu.dynamic_rotate %2 by %c255_i32 dim 1 : vector<8x256xf32>, i32 -> vector<8x256xf32>
    %c5 = arith.constant 5 : index
    %c0_17 = arith.constant 0 : index
    %c0_18 = arith.constant 0 : index
    %34 = vector.load %arg2[%c5, %c0_17, %c0_18] : memref<9x1x256xf32, #tpu.memory_space<vmem>>, vector<1x1x256xf32>
    %35 = vector.shape_cast %34 : vector<1x1x256xf32> to vector<1x256xf32>
    %36 = vector.broadcast %35 : vector<1x256xf32> to vector<8x256xf32>
    %37 = arith.mulf %33, %36 : vector<8x256xf32>
    %38 = arith.truncf %37 : vector<8x256xf32> to vector<8x256xbf16>
    %c40 = arith.constant 40 : index
    %c0_19 = arith.constant 0 : index
    %39 = vector.load %arg8[%c40, %c0_19] : memref<72x256xbf16, #tpu.memory_space<vmem>>, vector<8x256xbf16>
    tpu.vector_store %arg8[%c40, %c0_19], %38 {strides = array<i32>} : memref<72x256xbf16, #tpu.memory_space<vmem>>, vector<8x256xbf16>,
    %c241_i32 = arith.constant 241 : i32
    %40 = tpu.dynamic_rotate %2 by %c241_i32 dim 1 : vector<8x256xf32>, i32 -> vector<8x256xf32>
    %c6 = arith.constant 6 : index
    %c0_20 = arith.constant 0 : index
    %c0_21 = arith.constant 0 : index
    %41 = vector.load %arg2[%c6, %c0_20, %c0_21] : memref<9x1x256xf32, #tpu.memory_space<vmem>>, vector<1x1x256xf32>
    %42 = vector.shape_cast %41 : vector<1x1x256xf32> to vector<1x256xf32>
    %43 = vector.broadcast %42 : vector<1x256xf32> to vector<8x256xf32>
    %44 = arith.mulf %40, %43 : vector<8x256xf32>
    %45 = arith.truncf %44 : vector<8x256xf32> to vector<8x256xbf16>
    %c48 = arith.constant 48 : index
    %c0_22 = arith.constant 0 : index
    %46 = vector.load %arg8[%c48, %c0_22] : memref<72x256xbf16, #tpu.memory_space<vmem>>, vector<8x256xbf16>
    tpu.vector_store %arg8[%c48, %c0_22], %45 {strides = array<i32>} : memref<72x256xbf16, #tpu.memory_space<vmem>>, vector<8x256xbf16>,
    %c240_i32 = arith.constant 240 : i32
    %47 = tpu.dynamic_rotate %2 by %c240_i32 dim 1 : vector<8x256xf32>, i32 -> vector<8x256xf32>
    %c7 = arith.constant 7 : index
    %c0_23 = arith.constant 0 : index
    %c0_24 = arith.constant 0 : index
    %48 = vector.load %arg2[%c7, %c0_23, %c0_24] : memref<9x1x256xf32, #tpu.memory_space<vmem>>, vector<1x1x256xf32>
    %49 = vector.shape_cast %48 : vector<1x1x256xf32> to vector<1x256xf32>
    %50 = vector.broadcast %49 : vector<1x256xf32> to vector<8x256xf32>
    %51 = arith.mulf %47, %50 : vector<8x256xf32>
    %52 = arith.truncf %51 : vector<8x256xf32> to vector<8x256xbf16>
    %c56 = arith.constant 56 : index
    %c0_25 = arith.constant 0 : index
    %53 = vector.load %arg8[%c56, %c0_25] : memref<72x256xbf16, #tpu.memory_space<vmem>>, vector<8x256xbf16>
    tpu.vector_store %arg8[%c56, %c0_25], %52 {strides = array<i32>} : memref<72x256xbf16, #tpu.memory_space<vmem>>, vector<8x256xbf16>,
    %c239_i32 = arith.constant 239 : i32
    %54 = tpu.dynamic_rotate %2 by %c239_i32 dim 1 : vector<8x256xf32>, i32 -> vector<8x256xf32>
    %c8_26 = arith.constant 8 : index
    %c0_27 = arith.constant 0 : index
    %c0_28 = arith.constant 0 : index
    %55 = vector.load %arg2[%c8_26, %c0_27, %c0_28] : memref<9x1x256xf32, #tpu.memory_space<vmem>>, vector<1x1x256xf32>
    %56 = vector.shape_cast %55 : vector<1x1x256xf32> to vector<1x256xf32>
    %57 = vector.broadcast %56 : vector<1x256xf32> to vector<8x256xf32>
    %58 = arith.mulf %54, %57 : vector<8x256xf32>
    %59 = arith.truncf %58 : vector<8x256xf32> to vector<8x256xbf16>
    %c64 = arith.constant 64 : index
    %c0_29 = arith.constant 0 : index
    %60 = vector.load %arg8[%c64, %c0_29] : memref<72x256xbf16, #tpu.memory_space<vmem>>, vector<8x256xbf16>
    tpu.vector_store %arg8[%c64, %c0_29], %59 {strides = array<i32>} : memref<72x256xbf16, #tpu.memory_space<vmem>>, vector<8x256xbf16>,
    %c0_30 = arith.constant 0 : index
    %c0_31 = arith.constant 0 : index
    %61 = vector.load %arg3[%c0_30, %c0_31] : memref<8x72xbf16, #tpu.memory_space<vmem>>, vector<8x72xbf16>
    %c0_32 = arith.constant 0 : index
    %c0_33 = arith.constant 0 : index
    %62 = vector.load %arg8[%c0_32, %c0_33] : memref<72x256xbf16, #tpu.memory_space<vmem>>, vector<72x256xbf16>
    %cst = arith.constant dense<0.000000e+00> : vector<8x256xf32>
    %63 = tpu.matmul %61, %62, %cst {dimension_numbers = #tpu.dot_dimension_numbers<[1], [0], [0], [1], [0, 0, 1, 1], [], []>} : vector<8x72xbf16>, vector<72x256xbf16>, vector<8x256xf32> -> vector<8x256xf32>
    %c0_34 = arith.constant 0 : index
    %c0_35 = arith.constant 0 : index
    %64 = vector.load %arg4[%c0_34, %c0_35] : memref<8x1xf32, #tpu.memory_space<vmem>>, vector<8x1xf32>
    %65 = vector.broadcast %64 : vector<8x1xf32> to vector<8x256xf32>
    %66 = arith.addf %63, %65 : vector<8x256xf32>
    %cst_36 = arith.constant 0.000000e+00 : f32
    %67 = vector.broadcast %cst_36 : f32 to vector<8x256xf32>
    %68 = arith.maximumf %66, %67 : vector<8x256xf32>
    %c17_i32_37 = arith.constant 17 : i32
    %69 = tpu.dynamic_rotate %68 by %c17_i32_37 dim 1 : vector<8x256xf32>, i32 -> vector<8x256xf32>
    %c0_38 = arith.constant 0 : index
    %c0_39 = arith.constant 0 : index
    %c0_40 = arith.constant 0 : index
    %70 = vector.load %arg2[%c0_38, %c0_39, %c0_40] : memref<9x1x256xf32, #tpu.memory_space<vmem>>, vector<1x1x256xf32>
    %71 = vector.shape_cast %70 : vector<1x1x256xf32> to vector<1x256xf32>
    %72 = vector.broadcast %71 : vector<1x256xf32> to vector<8x256xf32>
    %73 = arith.mulf %69, %72 : vector<8x256xf32>
    %74 = arith.truncf %73 : vector<8x256xf32> to vector<8x256xbf16>
    %c0_41 = arith.constant 0 : index
    %c0_42 = arith.constant 0 : index
    %75 = vector.load %arg9[%c0_41, %c0_42] : memref<72x256xbf16, #tpu.memory_space<vmem>>, vector<8x256xbf16>
    tpu.vector_store %arg9[%c0_41, %c0_42], %74 {strides = array<i32>} : memref<72x256xbf16, #tpu.memory_space<vmem>>, vector<8x256xbf16>,
    %c16_i32_43 = arith.constant 16 : i32
    %76 = tpu.dynamic_rotate %68 by %c16_i32_43 dim 1 : vector<8x256xf32>, i32 -> vector<8x256xf32>
    %c1_44 = arith.constant 1 : index
    %c0_45 = arith.constant 0 : index
    %c0_46 = arith.constant 0 : index
    %77 = vector.load %arg2[%c1_44, %c0_45, %c0_46] : memref<9x1x256xf32, #tpu.memory_space<vmem>>, vector<1x1x256xf32>
    %78 = vector.shape_cast %77 : vector<1x1x256xf32> to vector<1x256xf32>
    %79 = vector.broadcast %78 : vector<1x256xf32> to vector<8x256xf32>
    %80 = arith.mulf %76, %79 : vector<8x256xf32>
    %81 = arith.truncf %80 : vector<8x256xf32> to vector<8x256xbf16>
    %c8_47 = arith.constant 8 : index
    %c0_48 = arith.constant 0 : index
    %82 = vector.load %arg9[%c8_47, %c0_48] : memref<72x256xbf16, #tpu.memory_space<vmem>>, vector<8x256xbf16>
    tpu.vector_store %arg9[%c8_47, %c0_48], %81 {strides = array<i32>} : memref<72x256xbf16, #tpu.memory_space<vmem>>, vector<8x256xbf16>,
    %c15_i32_49 = arith.constant 15 : i32
    %83 = tpu.dynamic_rotate %68 by %c15_i32_49 dim 1 : vector<8x256xf32>, i32 -> vector<8x256xf32>
    %c2_50 = arith.constant 2 : index
    %c0_51 = arith.constant 0 : index
    %c0_52 = arith.constant 0 : index
    %84 = vector.load %arg2[%c2_50, %c0_51, %c0_52] : memref<9x1x256xf32, #tpu.memory_space<vmem>>, vector<1x1x256xf32>
    %85 = vector.shape_cast %84 : vector<1x1x256xf32> to vector<1x256xf32>
    %86 = vector.broadcast %85 : vector<1x256xf32> to vector<8x256xf32>
    %87 = arith.mulf %83, %86 : vector<8x256xf32>
    %88 = arith.truncf %87 : vector<8x256xf32> to vector<8x256xbf16>
    %c16_53 = arith.constant 16 : index
    %c0_54 = arith.constant 0 : index
    %89 = vector.load %arg9[%c16_53, %c0_54] : memref<72x256xbf16, #tpu.memory_space<vmem>>, vector<8x256xbf16>
    tpu.vector_store %arg9[%c16_53, %c0_54], %88 {strides = array<i32>} : memref<72x256xbf16, #tpu.memory_space<vmem>>, vector<8x256xbf16>,
    %c1_i32_55 = arith.constant 1 : i32
    %90 = tpu.dynamic_rotate %68 by %c1_i32_55 dim 1 : vector<8x256xf32>, i32 -> vector<8x256xf32>
    %c3_56 = arith.constant 3 : index
    %c0_57 = arith.constant 0 : index
    %c0_58 = arith.constant 0 : index
    %91 = vector.load %arg2[%c3_56, %c0_57, %c0_58] : memref<9x1x256xf32, #tpu.memory_space<vmem>>, vector<1x1x256xf32>
    %92 = vector.shape_cast %91 : vector<1x1x256xf32> to vector<1x256xf32>
    %93 = vector.broadcast %92 : vector<1x256xf32> to vector<8x256xf32>
    %94 = arith.mulf %90, %93 : vector<8x256xf32>
    %95 = arith.truncf %94 : vector<8x256xf32> to vector<8x256xbf16>
    %c24_59 = arith.constant 24 : index
    %c0_60 = arith.constant 0 : index
    %96 = vector.load %arg9[%c24_59, %c0_60] : memref<72x256xbf16, #tpu.memory_space<vmem>>, vector<8x256xbf16>
    tpu.vector_store %arg9[%c24_59, %c0_60], %95 {strides = array<i32>} : memref<72x256xbf16, #tpu.memory_space<vmem>>, vector<8x256xbf16>,
    %97 = arith.truncf %68 : vector<8x256xf32> to vector<8x256xbf16>
    %c32_61 = arith.constant 32 : index
    %c0_62 = arith.constant 0 : index
    %98 = vector.load %arg9[%c32_61, %c0_62] : memref<72x256xbf16, #tpu.memory_space<vmem>>, vector<8x256xbf16>
    tpu.vector_store %arg9[%c32_61, %c0_62], %97 {strides = array<i32>} : memref<72x256xbf16, #tpu.memory_space<vmem>>, vector<8x256xbf16>,
    %c255_i32_63 = arith.constant 255 : i32
    %99 = tpu.dynamic_rotate %68 by %c255_i32_63 dim 1 : vector<8x256xf32>, i32 -> vector<8x256xf32>
    %c5_64 = arith.constant 5 : index
    %c0_65 = arith.constant 0 : index
    %c0_66 = arith.constant 0 : index
    %100 = vector.load %arg2[%c5_64, %c0_65, %c0_66] : memref<9x1x256xf32, #tpu.memory_space<vmem>>, vector<1x1x256xf32>
    %101 = vector.shape_cast %100 : vector<1x1x256xf32> to vector<1x256xf32>
    %102 = vector.broadcast %101 : vector<1x256xf32> to vector<8x256xf32>
    %103 = arith.mulf %99, %102 : vector<8x256xf32>
    %104 = arith.truncf %103 : vector<8x256xf32> to vector<8x256xbf16>
    %c40_67 = arith.constant 40 : index
    %c0_68 = arith.constant 0 : index
    %105 = vector.load %arg9[%c40_67, %c0_68] : memref<72x256xbf16, #tpu.memory_space<vmem>>, vector<8x256xbf16>
    tpu.vector_store %arg9[%c40_67, %c0_68], %104 {strides = array<i32>} : memref<72x256xbf16, #tpu.memory_space<vmem>>, vector<8x256xbf16>,
    %c241_i32_69 = arith.constant 241 : i32
    %106 = tpu.dynamic_rotate %68 by %c241_i32_69 dim 1 : vector<8x256xf32>, i32 -> vector<8x256xf32>
    %c6_70 = arith.constant 6 : index
    %c0_71 = arith.constant 0 : index
    %c0_72 = arith.constant 0 : index
    %107 = vector.load %arg2[%c6_70, %c0_71, %c0_72] : memref<9x1x256xf32, #tpu.memory_space<vmem>>, vector<1x1x256xf32>
    %108 = vector.shape_cast %107 : vector<1x1x256xf32> to vector<1x256xf32>
    %109 = vector.broadcast %108 : vector<1x256xf32> to vector<8x256xf32>
    %110 = arith.mulf %106, %109 : vector<8x256xf32>
    %111 = arith.truncf %110 : vector<8x256xf32> to vector<8x256xbf16>
    %c48_73 = arith.constant 48 : index
    %c0_74 = arith.constant 0 : index
    %112 = vector.load %arg9[%c48_73, %c0_74] : memref<72x256xbf16, #tpu.memory_space<vmem>>, vector<8x256xbf16>
    tpu.vector_store %arg9[%c48_73, %c0_74], %111 {strides = array<i32>} : memref<72x256xbf16, #tpu.memory_space<vmem>>, vector<8x256xbf16>,
    %c240_i32_75 = arith.constant 240 : i32
    %113 = tpu.dynamic_rotate %68 by %c240_i32_75 dim 1 : vector<8x256xf32>, i32 -> vector<8x256xf32>
    %c7_76 = arith.constant 7 : index
    %c0_77 = arith.constant 0 : index
    %c0_78 = arith.constant 0 : index
    %114 = vector.load %arg2[%c7_76, %c0_77, %c0_78] : memref<9x1x256xf32, #tpu.memory_space<vmem>>, vector<1x1x256xf32>
    %115 = vector.shape_cast %114 : vector<1x1x256xf32> to vector<1x256xf32>
    %116 = vector.broadcast %115 : vector<1x256xf32> to vector<8x256xf32>
    %117 = arith.mulf %113, %116 : vector<8x256xf32>
    %118 = arith.truncf %117 : vector<8x256xf32> to vector<8x256xbf16>
    %c56_79 = arith.constant 56 : index
    %c0_80 = arith.constant 0 : index
    %119 = vector.load %arg9[%c56_79, %c0_80] : memref<72x256xbf16, #tpu.memory_space<vmem>>, vector<8x256xbf16>
    tpu.vector_store %arg9[%c56_79, %c0_80], %118 {strides = array<i32>} : memref<72x256xbf16, #tpu.memory_space<vmem>>, vector<8x256xbf16>,
    %c239_i32_81 = arith.constant 239 : i32
    %120 = tpu.dynamic_rotate %68 by %c239_i32_81 dim 1 : vector<8x256xf32>, i32 -> vector<8x256xf32>
    %c8_82 = arith.constant 8 : index
    %c0_83 = arith.constant 0 : index
    %c0_84 = arith.constant 0 : index
    %121 = vector.load %arg2[%c8_82, %c0_83, %c0_84] : memref<9x1x256xf32, #tpu.memory_space<vmem>>, vector<1x1x256xf32>
    %122 = vector.shape_cast %121 : vector<1x1x256xf32> to vector<1x256xf32>
    %123 = vector.broadcast %122 : vector<1x256xf32> to vector<8x256xf32>
    %124 = arith.mulf %120, %123 : vector<8x256xf32>
    %125 = arith.truncf %124 : vector<8x256xf32> to vector<8x256xbf16>
    %c64_85 = arith.constant 64 : index
    %c0_86 = arith.constant 0 : index
    %126 = vector.load %arg9[%c64_85, %c0_86] : memref<72x256xbf16, #tpu.memory_space<vmem>>, vector<8x256xbf16>
    tpu.vector_store %arg9[%c64_85, %c0_86], %125 {strides = array<i32>} : memref<72x256xbf16, #tpu.memory_space<vmem>>, vector<8x256xbf16>,
    %c0_87 = arith.constant 0 : index
    %c0_88 = arith.constant 0 : index
    %127 = vector.load %arg5[%c0_87, %c0_88] : memref<8x72xbf16, #tpu.memory_space<vmem>>, vector<8x72xbf16>
    %c0_89 = arith.constant 0 : index
    %c0_90 = arith.constant 0 : index
    %128 = vector.load %arg9[%c0_89, %c0_90] : memref<72x256xbf16, #tpu.memory_space<vmem>>, vector<72x256xbf16>
    %cst_91 = arith.constant dense<0.000000e+00> : vector<8x256xf32>
    %129 = tpu.matmul %127, %128, %cst_91 {dimension_numbers = #tpu.dot_dimension_numbers<[1], [0], [0], [1], [0, 0, 1, 1], [], []>} : vector<8x72xbf16>, vector<72x256xbf16>, vector<8x256xf32> -> vector<8x256xf32>
    %c0_92 = arith.constant 0 : index
    %c0_93 = arith.constant 0 : index
    %130 = vector.load %arg6[%c0_92, %c0_93] : memref<8x1xf32, #tpu.memory_space<vmem>>, vector<8x1xf32>
    %131 = vector.broadcast %130 : vector<8x1xf32> to vector<8x256xf32>
    %132 = arith.addf %129, %131 : vector<8x256xf32>
    %cst_94 = arith.constant 0.000000e+00 : f32
    %133 = vector.broadcast %cst_94 : f32 to vector<8x256xf32>
    %134 = arith.maximumf %132, %133 : vector<8x256xf32>
    %c0_95 = arith.constant 0 : index
    %c0_96 = arith.constant 0 : index
    %c0_97 = arith.constant 0 : index
    %135 = vector.load %arg7[%c0_95, %c0_96, %c0_97] : memref<1x8x256xf32, #tpu.memory_space<vmem>>, vector<1x8x256xf32>
    %136 = vector.shape_cast %135 : vector<1x8x256xf32> to vector<8x256xf32>
    %137 = vector.shape_cast %134 : vector<8x256xf32> to vector<1x8x256xf32>
    tpu.vector_store %arg7[%c0_95, %c0_96, %c0_97], %137 {strides = array<i32>} : memref<1x8x256xf32, #tpu.memory_space<vmem>>, vector<1x8x256xf32>,
    return
  }
  func.func @transform_0(%arg0: i32) -> (i32, i32, i32) {
    %c0_i32 = arith.constant 0 : i32
    %c0_i32_0 = arith.constant 0 : i32
    %c0_i32_1 = arith.constant 0 : i32
    return %arg0, %c0_i32, %c0_i32_0 : i32, i32, i32
  }
  func.func @transform_1(%arg0: i32) -> (i32, i32, i32) {
    %c0_i32 = arith.constant 0 : i32
    %c0_i32_0 = arith.constant 0 : i32
    %c0_i32_1 = arith.constant 0 : i32
    %c0_i32_2 = arith.constant 0 : i32
    return %c0_i32, %c0_i32_0, %c0_i32_1 : i32, i32, i32
  }
  func.func @transform_2(%arg0: i32) -> (i32, i32) {
    %c0_i32 = arith.constant 0 : i32
    %c0_i32_0 = arith.constant 0 : i32
    %c0_i32_1 = arith.constant 0 : i32
    return %c0_i32, %c0_i32_0 : i32, i32
  }
  func.func @transform_3(%arg0: i32) -> (i32, i32) {
    %c0_i32 = arith.constant 0 : i32
    %c0_i32_0 = arith.constant 0 : i32
    %c0_i32_1 = arith.constant 0 : i32
    return %c0_i32, %c0_i32_0 : i32, i32
  }
  func.func @transform_4(%arg0: i32) -> (i32, i32) {
    %c0_i32 = arith.constant 0 : i32
    %c0_i32_0 = arith.constant 0 : i32
    %c0_i32_1 = arith.constant 0 : i32
    return %c0_i32, %c0_i32_0 : i32, i32
  }
  func.func @transform_5(%arg0: i32) -> (i32, i32) {
    %c0_i32 = arith.constant 0 : i32
    %c0_i32_0 = arith.constant 0 : i32
    %c0_i32_1 = arith.constant 0 : i32
    return %c0_i32, %c0_i32_0 : i32, i32
  }
  func.func @transform_6(%arg0: i32) -> (i32, i32, i32) {
    %c0_i32 = arith.constant 0 : i32
    %c0_i32_0 = arith.constant 0 : i32
    %c0_i32_1 = arith.constant 0 : i32
    return %arg0, %c0_i32, %c0_i32_0 : i32, i32, i32
  }
}

</mosaic_0001>

<bundles_post_ra>
// kernel: tpu_custom_call.1
= control target key start
LH: loop header
LB: loop body
LE: loop exit
PB: predicated region body
PF: predicated region fallthrough
CT: control target
= control target key end

     0   :  { %11 = vsyncpa [#allocation5], 0  ;;  %s1833_s0 = inlined_call_operand.hbm [shape: bf16[2,8,256], index: 0, kind: input, shape index: {}]   ;;  %s1834_s1 = inlined_call_operand.vmem [shape: f32[9,1,256], index: 1, kind: input, shape index: {}]   ;;  %s1835_s2 = inlined_call_operand.vmem [shape: bf16[8,72], index: 2, kind: input, shape index: {}]   ;;  %s1836_s3 = inlined_call_operand.vmem [shape: f32[8,1], index: 3, kind: input, shape index: {}]   ;;  %s1837_s4 = inlined_call_operand.vmem [shape: bf16[8,72], index: 4, kind: input, shape index: {}]   ;;  %s1838_s5 = inlined_call_operand.vmem [shape: f32[8,1], index: 5, kind: input, shape index: {}]   ;;  %s1839_s6 = inlined_call_operand.hbm [shape: f32[2,8,256], index: 6, kind: output, shape index: {}]  }
   0x1   :  { %13 = vsyncpa [#allocation5 + $0x1], 0 }
   0x2   :  { %14 = vsyncpa [#allocation6], 0 }
   0x3   :  { %16 = vsyncpa [#allocation6 + $0x1], 0  ;;  %s1424_s21 = smov 0   ;;  %s1426_s22 = smov 0  }
   0x4   :  { %s1428_s23 = smov 0   ;;  %s1430_s24 = smov 0  }
   0x5 LB: > { %s1445_s25 = sadd.s32 4294967295, %s1376_s24   ;;  %s1078_s26 = sadd.s32 4294967294, %s1376_s24   ;;  %s1376_s24 = sphi %s1430_s24, %s1854_s24   ;;  %s1372_s23 = sphi %s1428_s23, %s1853_s23   ;;  %s1368_s22 = sphi %s1426_s22, %s1852_s22   ;;  %s1364_s21 = sphi %s1424_s21, %s1851_s21  }
   0x6   : > { %s1449_s27 = sadd.s32 1, %s1376_s24   ;;  %s29_s28 = sadd.s32 1, %s1372_s23 }
   0x7   : > { %s26_s29 = ssub.s32 %s1376_s24, %s1449_s27  ;;  %p36_p0 = scmp.ne.s32.totalorder %s1372_s23, %s1368_s22 }
   0x8   : > { %p27_p1 = scmp.eq.s32.totalorder %s26_s29, 0  ;;  %p37_p2 = scmp.eq.s32.totalorder %s1376_s24, 0 }
   0x9   : > { %p42_p3 = scmp.ne.s32.totalorder %s1368_s22, %s1364_s21  ;;  %p43_p4 = scmp.eq.s32.totalorder %s1445_s25, 0 }
   0xa   : > { %s1461_s30 = scalar_select %p27_p1, %s1372_s23, %s29_s28  }
   0xb   : > { %p1463_p5 = por %p37_p2, %p36_p0  ;;  %p1467_p6 = por %p43_p4, %p42_p3 }
   0xc   : > { %p171_p7 = scmp.eq.s32.totalorder %s1445_s25, 1  ;;  %p177_p8 = scmp.eq.s32.totalorder %s1078_s26, 1 }
   0xd   : > { %p1196_p10 = scmp.lt.s32.totalorder %s1376_s24, 2  ;;  %s212_s11 = sand.u32 1, %s1372_s23  }
   0xe   : > { %p1474_p11 = por %p171_p7, %p36_p0  ;;  %p1478_p12 = por %p177_p8, %p42_p3 }
   0xf   : > { %s1147_s12 = sshll.u32 %s1376_s24, 7  ;;  %s1081_s13 = sshll.u32 %s212_s11, 3 }
  0x10   : > { %s1843_s9 = scalar_select %p1474_p11, 1, 0 }
  0x11   : > { %s1844_s10 = scalar_select %p1478_p12, 1, 0 }
  0x12   : > { %s1487_s16 = scalar_lea.hbm %s1833_s0, %s1147_s12  ;;  %s216_s17 = scalar_lea.vmem [#allocation4], %s1081_s13 }
  0x13   : > { %s224_s18 = sshll.u32 %s216_s17, 4  ;;  %p1491_p13 = pnand %p1196_p10, %p1463_p5  ;;  %s1495_s18 = int_to_ptr.vmem [resolvable:$true] %s224_s18 }
  0x14   : > { %s213_s20 = scalar_lea.sflag [#allocation5], %s212_s11  ;;  %s1280_s26 = scalar_lea.hbm %s1487_s16, 128 }
  0x15   : > { %p1281_p2 = scmp.ne.s32.totalorder %s1487_s16, %s1280_s26  ;;  %p1282_p3 = pneg %p1491_p13 }
  0x16   : > { %s1285_s7 = scalar_lea.hbm %s1833_s0, 256  ;;  %p1286_p5 = scmp.lt.u32.totalorder %s1487_s16, %s1833_s0 }
  0x17   : > { %p1283_p4 = pnand %p1282_p3, %p1281_p2  ;;  %p1287_p8 = scmp.lt.u32.totalorder %s1285_s7, %s1280_s26 }
  0x18   : > { %p1289_p9 = scmp.lt.u32.totalorder %s1280_s26, %s1487_s16 }
  0x19   : > { %p1284_p7 = pneg %p1283_p4  ;;  %p1288_p10 = por %p1287_p8, %p1286_p5 }
  0x1b   : > { %p1290_p0 = por %p1289_p9, %p1288_p10 }
  0x1d   : > { %p1291_p1 = pnand %p1290_p0, %p1284_p7 }
  0x1f   : > { %1294 = shalt.err (!%p1291_p1)
}
  0x20   : > { %s1295_s11 = scalar_lea.vmem %s1495_s18, 128  ;;  %s1378_s14 = smov [#allocation4]  }
  0x21   : > { %p1296_p2 = scmp.ne.s32.totalorder %s1495_s18, %s1295_s11  ;;  %s1300_s15 = sshll.u32 %s1378_s14, 4  ;;  %s1301_s15 = int_to_ptr.vmem [resolvable:$false] %s1300_s15 }
  0x22   : > { %s1302_s17 = scalar_lea.vmem %s1301_s15, 256  ;;  %p1303_p11 = scmp.lt.s32.totalorder %s1495_s18, %s1301_s15 }
  0x23   : > { %p1298_p4 = pnand %p1296_p2, %p1282_p3  ;;  %p1304_p5 = scmp.lt.s32.totalorder %s1302_s17, %s1295_s11 }
  0x25   : > { %p1299_p12 = pneg %p1298_p4  ;;  %p1305_p8 = por %p1304_p5, %p1303_p11 }
  0x27   : > { %p1306_p9 = pnand %p1305_p8, %p1299_p12 }
  0x29   : > { %1309 = shalt.err (!%p1306_p9)
}
  0x2a   : > { %1191 = dma.hbm_to_vmem [thread:$0]  (!%p1491_p13), %s1487_s16, 128, %s1495_s18, %s213_s20  }
  0x2b   : > { %p1846_p0 = scmp.lt.s32.totalorder %s1376_s24, 3  ;;  %p1847_p1 = scmp.ge.s32.totalorder %s1376_s24, 1 }
  0x2d   : > { %p230_p3 = pnand %p1847_p1, %p1846_p0 }
  0x2e   : > { %s1529_s26 = sand.u32 (!%p230_p3), 1, %s1368_s22  }
  0x2f   : > { %233 = sbr.rel (%p230_p3) target bundleno = 809 (0x329), region = 44  ;;  %s1085_s28 = sshll.u32 (!%p230_p3), %s1529_s26, 3 }
  0x30   : > { %s236_s29 = scalar_lea.sflag (!%p230_p3), [#allocation5], %s1529_s26  ;;  %s239_s7 = scalar_lea.vmem (!%p230_p3), [#allocation4], %s1085_s28 }
  0x36   : > { %1355 = dma.done.wait (%p1467_p6), %s236_s29, 128  }
  0x37   : > { %1357 = vsyncadd (%p1467_p6), %s236_s29, 4294967168  ;;  %v1537_v0 = vld [vmem:[%s239_s7] sm:$0xff]  ;;  %s1379_s16 = smov 15   ;;  %s1380_s18 = smov 17   ;;  %v1387_v4 = vmov 0   ;;  %v276_v6 = vlaneseq  ;;  %vm587_vm8 = vcmask 1043456  }
  0x38   : > { %v270_v1 = vunpack.c.l.bf16 %v1537_v0  ;;  %v271_v2 = vunpack.c.h.bf16 %v1537_v0  ;;  %s1381_s19 = smov 1   ;;  %s1382_s20 = smov 16   ;;  %626 = vmatprep.mubr.bf16.mxu0 %v1387_v4  ;;  %1279 = vset.pattern.permute.xlu0 %v1387_v4  ;;  %v532_v5 = vld [vmem:[%s1836_s3] sm:$0xff]  ;;  %v1561_v11 = vld [vmem:[%s1834_s1 + $0xa] sm:$0x3]  ;;  %vm583_vm9 = vcmask 588800  }
  0x39   : > { %s1383_s8 = smov 127   ;;  %s1384_s12 = smov 113   ;;  %980 = vmatprep.mubr.bf16.mxu1 %v1387_v4  ;;  %v284_v7 = vshrl.u32 %v276_v6, 7  ;;  %v1552_v8 = vand.u32 127, %v276_v6  ;;  %v281_v12 = vld [vmem:[%s1834_s1] sm:$0x3] }
  0x3a   : > { %v1249_v3 = vpack.i.bf16 %v271_v2, %v270_v1  ;;  %s1385_s13 = smov 112   ;;  %s1386_s11 = smov 111   ;;  %v1088_v13 = vld [vmem:[%s1834_s1 + $0x2] sm:$0x3]  ;;  %v1090_v15 = vld [vmem:[%s1834_s1 + $0x4] sm:$0x3] }
  0x3b   : > { %v1554_v9 = vsub.s32 0, %v284_v7  ;;  %v1556_v10 = vsub.s32 1, %v284_v7  ;;  %vm339_vm0 = vcmp.lt.s32.totalorder %v1552_v8, 15  ;;  %vm370_vm1 = vcmp.lt.s32.totalorder %v1552_v8, 1  ;;  %v1092_v16 = vld [vmem:[%s1834_s1 + $0x6] sm:$0x3] }
  0x3c   : > { %1250 = vrot.lane.b32.xlu1 %v1249_v3, %s1379_s16  ;;  %1240 = vrot.lane.b32.xlu0 %v1249_v3, %s1380_s18  ;;  %vm278_vm2 = vcmp.lt.s32.totalorder %v1552_v8, 17  ;;  %vm308_vm3 = vcmp.lt.s32.totalorder %v1552_v8, 16  ;;  %vm402_vm4 = vcmp.lt.s32.totalorder %v1552_v8, 127  ;;  %v1590_v27 = vld [vmem:[%s1834_s1 + $0x10] sm:$0x3]  ;;  %vm433_vm5 = vcmp.lt.s32.totalorder %v1552_v8, 113 }
  0x3d   : > { %v411_v14 = vrot.slane %v1561_v11, %v1554_v9  ;;  %v415_v19 = vrot.slane %v1561_v11, %v1556_v10  ;;  %v290_v20 = vrot.slane %v281_v12, %v1556_v10  ;;  %v321_v21 = vrot.slane %v1088_v13, %v1556_v10  ;;  %v1595_v28 = vld [vmem:[%s1834_s1 + $0xc] sm:$0x3]  ;;  %v1610_v36 = vld [vmem:[%s1834_s1 + $0xe] sm:$0x3]  ;;  %p1848_p11 = scmp.ne.s32.totalorder %s1843_s9, 0 }
  0x3e   : > { %v286_v22 = vrot.slane %v281_v12, %v1554_v9  ;;  %v317_v29 = vrot.slane %v1088_v13, %v1554_v9  ;;  %v352_v30 = vrot.slane %v1090_v15, %v1556_v10  ;;  %v383_v31 = vrot.slane %v1092_v16, %v1556_v10 }
  0x3f   : > { %v348_v34 = vrot.slane %v1090_v15, %v1554_v9  ;;  %v379_v35 = vrot.slane %v1092_v16, %v1554_v9  ;;  %vm464_vm6 = vcmp.lt.s32.totalorder %v1552_v8, 112  ;;  %vm495_vm7 = vcmp.lt.s32.totalorder %v1552_v8, 111 }
  0x40   : > { %1255 = vrot.lane.b32.xlu1 %v1249_v3, %s1381_s19  ;;  %1245 = vrot.lane.b32.xlu0 %v1249_v3, %s1382_s20  ;;  %v508_v40 = vrot.slane %v1590_v27, %v1556_v10  ;;  %v446_v41 = vrot.slane %v1595_v28, %v1556_v10  ;;  %v442_v42 = vrot.slane %v1595_v28, %v1554_v9 }
  0x41   : > { %v477_v50 = vrot.slane %v1610_v36, %v1556_v10  ;;  %v473_v13 = vrot.slane %v1610_v36, %v1554_v9 }
  0x44   : > { %1260 = vrot.lane.b32.xlu0 %v1249_v3, %s1383_s8  ;;  %1265 = vrot.lane.b32.xlu1 %v1249_v3, %s1384_s12 }
  0x48   : > { %1270 = vrot.lane.b32.xlu0 %v1249_v3, %s1385_s13  ;;  %1275 = vrot.lane.b32.xlu1 %v1249_v3, %s1386_s11 }
  0x4c   : > { %535 = vperm.xlu0 %1279, %v532_v5  }
  0xae   : > { %v1251_v17 = vpop.permute.xlu1 %1250  ;;  %v1241_v18 = vpop.permute.xlu0 %1240 }
  0xaf   : > { %v1253_v23 = vunpack.i.h.bf16 %v1251_v17  ;;  %v1252_v24 = vunpack.i.l.bf16 %v1251_v17  ;;  %v1243_v25 = vunpack.i.h.bf16 %v1241_v18  ;;  %v1242_v26 = vunpack.i.l.bf16 %v1241_v18 }
  0xb1   : > { %v279_v32 = vsel %vm278_vm2, %v1242_v26, %v1243_v25  ;;  %v280_v33 = vsel %vm278_vm2, %v1243_v25, %v1242_v26  ;;  %v340_v37 = vsel %vm339_vm0, %v1252_v24, %v1253_v23  ;;  %v341_v47 = vsel %vm339_vm0, %v1253_v23, %v1252_v24 }
  0xb2   : > { %v1256_v38 = vpop.permute.xlu1 %1255  ;;  %v1246_v39 = vpop.permute.xlu0 %1245  ;;  %v294_v48 = vmul.f32 %v290_v20, %v279_v32  ;;  %v293_v49 = vmul.f32 %v286_v22, %v280_v33  ;;  %v356_v58 = vmul.f32 %v352_v30, %v340_v37  ;;  %v355_v4 = vmul.f32 %v348_v34, %v341_v47 }
  0xb3   : > { %v1258_v43 = vunpack.i.h.bf16 %v1256_v38  ;;  %v1257_v44 = vunpack.i.l.bf16 %v1256_v38  ;;  %v1248_v45 = vunpack.i.h.bf16 %v1246_v39  ;;  %v1247_v46 = vunpack.i.l.bf16 %v1246_v39 }
  0xb5   : > { %v371_v51 = vsel %vm370_vm1, %v1257_v44, %v1258_v43  ;;  %v372_v52 = vsel %vm370_vm1, %v1258_v43, %v1257_v44  ;;  %v309_v53 = vsel %vm308_vm3, %v1247_v46, %v1248_v45  ;;  %v310_v54 = vsel %vm308_vm3, %v1248_v45, %v1247_v46 }
  0xb6   : > { %v1261_v55 = vpop.permute.xlu0 %1260  ;;  %v325_v56 = vmul.f32 %v321_v21, %v309_v53  ;;  %v324_v57 = vmul.f32 %v317_v29, %v310_v54  ;;  %v387_v59 = vmul.f32 %v383_v31, %v371_v51  ;;  %v1266_v60 = vpop.permute.xlu1 %1265  ;;  %v386_v5 = vmul.f32 %v379_v35, %v372_v52  ;;  %v888_v52 = vld [vmem:[%s1838_s5] sm:$0xff] }
  0xb7   : > { %v1263_v61 = vunpack.i.h.bf16 %v1261_v55  ;;  %v1262_v62 = vunpack.i.l.bf16 %v1261_v55  ;;  %v1268_v63 = vunpack.i.h.bf16 %v1266_v60  ;;  %v1267_v1 = vunpack.i.l.bf16 %v1266_v60  ;;  %v643_v55 = vld [vmem:[%s1834_s1] sm:$0x3] }
  0xb8   : > { %v1167_v2 = vpack.c.bf16 %v325_v56, %v294_v48  ;;  %v1166_v3 = vpack.c.bf16 %v324_v57, %v293_v49  ;;  %v1169_v17 = vpack.c.bf16 %v387_v59, %v356_v58  ;;  %v504_v21 = vrot.slane %v1590_v27, %v1554_v9  ;;  %v1115_v56 = vld [vmem:[%s1834_s1 + $0x2] sm:$0x3] }
  0xb9   : > { %v403_v6 = vsel %vm402_vm4, %v1262_v62, %v1263_v61  ;;  %v404_v7 = vsel %vm402_vm4, %v1263_v61, %v1262_v62  ;;  %v435_v12 = vsel %vm433_vm5, %v1268_v63, %v1267_v1  ;;  %v434_v26 = vsel %vm433_vm5, %v1267_v1, %v1268_v63 }
  0xba   : > { %v418_v15 = vmul.f32 %v411_v14, %v403_v6  ;;  %v419_v16 = vmul.f32 %v415_v19, %v404_v7  ;;  %594 = vmatprep.subr.bf16.mxu0 %v1167_v2  ;;  %v1271_v18 = vpop.permute.xlu0 %1270  ;;  %v1276_v20 = vpop.permute.xlu1 %1275  ;;  %v1168_v28 = vpack.c.bf16 %v386_v5, %v355_v4  ;;  %v450_v14 = vmul.f32 %v446_v41, %v435_v12 }
  0xbb   : > { %595 = vmatpush1.bf16.msra.mxu0 %v1166_v3  ;;  %v1273_v22 = vunpack.i.h.bf16 %v1271_v18  ;;  %v1272_v23 = vunpack.i.l.bf16 %v1271_v18  ;;  %v1278_v24 = vunpack.i.h.bf16 %v1276_v20  ;;  %v1277_v25 = vunpack.i.l.bf16 %v1276_v20 }
  0xbc   : > { %596 = vmatprep.subr.bf16.mxu0 %v1169_v17  ;;  %v1152_v11 = vpack.c.bf16 %v419_v16, %v418_v15  ;;  %v449_v34 = vmul.f32 %v442_v42, %v434_v26  ;;  %v648_v59 = vrot.slane %v643_v55, %v1554_v9  ;;  %v677_v60 = vrot.slane %v1115_v56, %v1554_v9  ;;  %v1117_v15 = vld [vmem:[%s1834_s1 + $0x4] sm:$0x3]  ;;  %v1119_v16 = vld [vmem:[%s1834_s1 + $0x6] sm:$0x3]  ;;  %v1122_v26 = vld [vmem:[%s1834_s1 + $0xa] sm:$0x3] }
  0xbd   : > { %v465_v19 = vsel %vm464_vm6, %v1272_v23, %v1273_v22  ;;  %v466_v29 = vsel %vm464_vm6, %v1273_v22, %v1272_v23  ;;  %v497_v27 = vsel %vm495_vm7, %v1278_v24, %v1277_v25  ;;  %v496_v30 = vsel %vm495_vm7, %v1277_v25, %v1278_v24 }
  0xbe   : > { %v1107_v31 = vcombine.high %v1537_v0, %v1152_v11  ;;  %v481_v32 = vmul.f32 %v477_v50, %v466_v29  ;;  %v1106_v33 = vcombine.low %v1537_v0, %v1152_v11  ;;  %v480_v35 = vmul.f32 %v473_v13, %v465_v19  ;;  %v522_v0 = vld [vmem:[%s1835_s2] sm:$0xf] }
  0xbf   : > { %597 = vmatpush1.bf16.msra.mxu0 %v1168_v28  ;;  %v512_v36 = vmul.f32 %v508_v40, %v497_v27  ;;  %v511_v38 = vmul.f32 %v504_v21, %v496_v30  ;;  %v652_v61 = vrot.slane %v643_v55, %v1556_v10  ;;  %v681_v62 = vrot.slane %v1115_v56, %v1556_v10 }
  0xc0   : > { %598 = vmatprep.subr.bf16.mxu0 %v1107_v31  ;;  %v1171_v37 = vpack.c.bf16 %v481_v32, %v450_v14  ;;  %v1170_v39 = vpack.c.bf16 %v480_v35, %v449_v34  ;;  %v706_v22 = vrot.slane %v1117_v15, %v1554_v9  ;;  %v710_v23 = vrot.slane %v1117_v15, %v1556_v10  ;;  %v878_v15 = vld [vmem:[%s1837_s4] sm:$0xf] }
  0xc1   : > { %v1173_v41 = vpack.c.bf16 %v512_v36, %v512_v36  ;;  %v1172_v43 = vpack.c.bf16 %v511_v38, %v511_v38  ;;  %v735_v24 = vrot.slane %v1119_v16, %v1554_v9  ;;  %v739_v25 = vrot.slane %v1119_v16, %v1556_v10 }
  0xc2   : > { %v773_v27 = vrot.slane %v1122_v26, %v1554_v9  ;;  %v777_v30 = vrot.slane %v1122_v26, %v1556_v10 }
  0xc3   : > { %599 = vmatpush1.bf16.msra.mxu0 %v1106_v33  ;;  %v589_v44 = vsel %vm587_vm8, %v1172_v43, 0 }
  0xc4   : > { %600 = vmatprep.subr.bf16.mxu0 %v1171_v37 }
  0xc7   : > { %601 = vmatpush1.bf16.msra.mxu0 %v1170_v39 }
  0xc8   : > { %1112 = vmatprep.subr.msk.bf16.mxu0 %vm587_vm8, %v1173_v41 }
  0xcb   : > { %603 = vmatpush1.bf16.msra.mxu0 %v589_v44  ;;  %v536_v40 = vpop.permute.xlu0 %535 }
  0xce   : > { %1113 = vmatmul.mubr.msk.bf16.vlgmr.msra.gmra.mrb[0].mxu0 %vm583_vm9, %v522_v0  ;;  %v1124_v0 = vld [vmem:[%s1834_s1 + $0xc] sm:$0x3] }
 0x1a1   : > { %v628_v42 = vpop.f32.mrb[0].mxu0 }
 0x1a2   : > { %v629_v45 = vadd.f32 %v628_v42, %v536_v40  ;;  %v630_v46 = vpop.f32.mrb[1].mxu0 }
 0x1a3   : > { %v632_v47 = vpop.f32.mrb[2].mxu0  ;;  %v631_v49 = vadd.f32 %v630_v46, %v536_v40  ;;  %v1126_v40 = vld [vmem:[%s1834_s1 + $0xe] sm:$0x3] }
 0x1a4   : > { %v1665_v48 = vmax.f32 %v629_v45, 0.0  ;;  %v633_v50 = vpop.f32.mrb[3].mxu0 }
 0x1a5   : > { %v1671_v51 = vmax.f32 %v631_v49, 0.0  ;;  %v802_v49 = vrot.slane %v1124_v0, %v1554_v9  ;;  %v806_v50 = vrot.slane %v1124_v0, %v1556_v10 }
 0x1a6   : > { %666 = vrot.lane.b32.xlu0 %v1665_v48, %s1382_s20  ;;  %637 = vrot.lane.b32.xlu1 %v1665_v48, %s1380_s18 }
 0x1aa   : > { %695 = vrot.lane.b32.xlu0 %v1665_v48, %s1379_s16  ;;  %639 = vrot.lane.b32.xlu1 %v1671_v51, %s1380_s18  ;;  %s1388_s18 = smov [#allocation7]  }
 0x1ae   : > { %724 = vrot.lane.b32.xlu0 %v1665_v48, %s1381_s19  ;;  %668 = vrot.lane.b32.xlu1 %v1671_v51, %s1382_s20 }
 0x1b2   : > { %762 = vrot.lane.b32.xlu0 %v1665_v48, %s1383_s8  ;;  %697 = vrot.lane.b32.xlu1 %v1671_v51, %s1379_s16  ;;  %s1314_s16 = sshll.u32 %s1388_s18, 4  ;;  %s1315_s16 = int_to_ptr.vmem [resolvable:$false] %s1314_s16 }
 0x1b6   : > { %791 = vrot.lane.b32.xlu0 %v1665_v48, %s1384_s12  ;;  %726 = vrot.lane.b32.xlu1 %v1671_v51, %s1381_s19  ;;  %s1316_s19 = scalar_lea.vmem %s1315_s16, 512 }
 0x1ba   : > { %820 = vrot.lane.b32.xlu0 %v1665_v48, %s1385_s13  ;;  %764 = vrot.lane.b32.xlu1 %v1671_v51, %s1383_s8 }
 0x1be   : > { %849 = vrot.lane.b32.xlu0 %v1665_v48, %s1386_s11  ;;  %793 = vrot.lane.b32.xlu1 %v1671_v51, %s1384_s12  ;;  %s1086_s12 = sshll.u32 %s1529_s26, 4 }
 0x1c2   : > { %891 = vperm.xlu0 %1279, %v888_v52   ;;  %822 = vrot.lane.b32.xlu1 %v1671_v51, %s1385_s13  ;;  %v831_v52 = vrot.slane %v1126_v40, %v1554_v9  ;;  %s1165_s13 = sshll.u32 %s1445_s25, 8  ;;  %s994_s25 = scalar_lea.sflag [#allocation6], %s1529_s26 }
 0x1c3   : > { %s1789_s14 = scalar_lea.hbm %s1839_s6, %s1165_s13 }
 0x1c6   : > { %851 = vrot.lane.b32.xlu1 %v1671_v51, %s1386_s11  ;;  %s267_s11 = scalar_lea.vmem [#allocation7], %s1086_s12 }
 0x1c7   : > { %s1008_s28 = sshll.u32 %s267_s11, 4  ;;  %s1791_s28 = int_to_ptr.vmem [resolvable:$true] %s1008_s28 }
 0x1c8   : > { %s1310_s15 = scalar_lea.vmem %s1791_s28, 256  ;;  %p1317_p7 = scmp.lt.s32.totalorder %s1791_s28, %s1315_s16 }
 0x1c9   : > { %p1311_p6 = scmp.ne.s32.totalorder %s1791_s28, %s1310_s15  ;;  %p1318_p10 = scmp.lt.s32.totalorder %s1316_s19, %s1310_s15 }
 0x1cb   : > { %p1312_p12 = pnand %p1311_p6, %p1848_p11  ;;  %p1319_p2 = por %p1318_p10, %p1317_p7 }
 0x1cd   : > { %p1313_p13 = pneg %p1312_p12 }
 0x1cf   : > { %p1320_p4 = pnand %p1319_p2, %p1313_p13 }
 0x218   : > { %v667_v53 = vpop.permute.xlu0 %666  ;;  %v638_v54 = vpop.permute.xlu1 %637 }
 0x21c   : > { %v696_v57 = vpop.permute.xlu0 %695  ;;  %v640_v58 = vpop.permute.xlu1 %639 }
 0x21d   : > { %v641_v63 = vsel %vm278_vm2, %v638_v54, %v640_v58  ;;  %v642_v1 = vsel %vm278_vm2, %v640_v58, %v638_v54  ;;  %v1128_v54 = vld [vmem:[%s1834_s1 + $0x10] sm:$0x3] }
 0x21e   : > { %v655_v6 = vmul.f32 %v648_v59, %v642_v1  ;;  %v656_v12 = vmul.f32 %v652_v61, %v641_v63  ;;  %v860_v58 = vrot.slane %v1128_v54, %v1554_v9  ;;  %v864_v59 = vrot.slane %v1128_v54, %v1556_v10 }
 0x220   : > { %v725_v2 = vpop.permute.xlu0 %724  ;;  %v669_v3 = vpop.permute.xlu1 %668 }
 0x221   : > { %v670_v4 = vsel %vm308_vm3, %v667_v53, %v669_v3  ;;  %v671_v5 = vsel %vm308_vm3, %v669_v3, %v667_v53  ;;  %v835_v53 = vrot.slane %v1126_v40, %v1556_v10 }
 0x222   : > { %v684_v7 = vmul.f32 %v677_v60, %v671_v5  ;;  %v685_v13 = vmul.f32 %v681_v62, %v670_v4 }
 0x224   : > { %v698_v17 = vpop.permute.xlu1 %697  ;;  %v1175_v18 = vpack.c.bf16 %v685_v13, %v656_v12  ;;  %v1174_v20 = vpack.c.bf16 %v684_v7, %v655_v6  ;;  %v763_v21 = vpop.permute.xlu0 %762 }
 0x225   : > { %v699_v28 = vsel %vm339_vm0, %v696_v57, %v698_v17  ;;  %v700_v11 = vsel %vm339_vm0, %v698_v17, %v696_v57 }
 0x226   : > { %948 = vmatprep.subr.bf16.mxu1 %v1175_v18  ;;  %v713_v31 = vmul.f32 %v706_v22, %v700_v11  ;;  %v714_v32 = vmul.f32 %v710_v23, %v699_v28 }
 0x227   : > { %949 = vmatpush1.bf16.msra.mxu1 %v1174_v20 }
 0x228   : > { %v727_v14 = vpop.permute.xlu1 %726  ;;  %v792_v35 = vpop.permute.xlu0 %791 }
 0x229   : > { %v728_v19 = vsel %vm370_vm1, %v725_v2, %v727_v14  ;;  %v729_v29 = vsel %vm370_vm1, %v727_v14, %v725_v2 }
 0x22a   : > { %v742_v33 = vmul.f32 %v735_v24, %v729_v29  ;;  %v743_v34 = vmul.f32 %v739_v25, %v728_v19 }
 0x22c   : > { %v765_v36 = vpop.permute.xlu1 %764  ;;  %v1177_v37 = vpack.c.bf16 %v743_v34, %v714_v32  ;;  %v1176_v38 = vpack.c.bf16 %v742_v33, %v713_v31  ;;  %v821_v47 = vpop.permute.xlu0 %820 }
 0x22d   : > { %v766_v39 = vsel %vm402_vm4, %v763_v21, %v765_v36  ;;  %v767_v41 = vsel %vm402_vm4, %v765_v36, %v763_v21 }
 0x22e   : > { %v780_v43 = vmul.f32 %v773_v27, %v766_v39  ;;  %v781_v44 = vmul.f32 %v777_v30, %v767_v41  ;;  %950 = vmatprep.subr.bf16.mxu1 %v1177_v37 }
 0x22f   : > { %951 = vmatpush1.bf16.msra.mxu1 %v1176_v38 }
 0x230   : > { %v794_v42 = vpop.permute.xlu1 %793  ;;  %v1179_v45 = vpack.c.bf16 %v781_v44, %v1671_v51  ;;  %v1178_v46 = vpack.c.bf16 %v780_v43, %v1665_v48  ;;  %v850_v1 = vpop.permute.xlu0 %849 }
 0x231   : > { %v795_v55 = vsel %vm433_vm5, %v792_v35, %v794_v42  ;;  %v796_v48 = vsel %vm433_vm5, %v794_v42, %v792_v35 }
 0x232   : > { %952 = vmatprep.subr.bf16.mxu1 %v1179_v45  ;;  %v809_v60 = vmul.f32 %v802_v49, %v795_v55  ;;  %v810_v61 = vmul.f32 %v806_v50, %v796_v48 }
 0x233   : > { %953 = vmatpush1.bf16.msra.mxu1 %v1178_v46 }
 0x234   : > { %v823_v51 = vpop.permute.xlu1 %822 }
 0x235   : > { %v824_v56 = vsel %vm464_vm6, %v821_v47, %v823_v51  ;;  %v825_v57 = vsel %vm464_vm6, %v823_v51, %v821_v47 }
 0x236   : > { %v838_v62 = vmul.f32 %v831_v52, %v824_v56  ;;  %v839_v63 = vmul.f32 %v835_v53, %v825_v57 }
 0x238   : > { %v852_v2 = vpop.permute.xlu1 %851  ;;  %v1181_v3 = vpack.c.bf16 %v839_v63, %v810_v61  ;;  %v1180_v4 = vpack.c.bf16 %v838_v62, %v809_v60 }
 0x239   : > { %v853_v5 = vsel %vm495_vm7, %v850_v1, %v852_v2  ;;  %v854_v6 = vsel %vm495_vm7, %v852_v2, %v850_v1 }
 0x23a   : > { %v867_v7 = vmul.f32 %v860_v58, %v853_v5  ;;  %v868_v9 = vmul.f32 %v864_v59, %v854_v6  ;;  %954 = vmatprep.subr.bf16.mxu1 %v1181_v3 }
 0x23b   : > { %955 = vmatpush1.bf16.msra.mxu1 %v1180_v4 }
 0x23c   : > { %v1182_v10 = vpack.c.bf16 %v867_v7, %v867_v7  ;;  %v1183_v12 = vpack.c.bf16 %v868_v9, %v868_v9 }
 0x23e   : > { %1140 = vmatprep.subr.msk.bf16.mxu1 %vm587_vm8, %v1183_v12  ;;  %v943_v13 = vsel %vm587_vm8, %v1182_v10, 0 }
 0x23f   : > { %957 = vmatpush1.bf16.msra.mxu1 %v943_v13 }
 0x241   : > { %v892_v8 = vpop.permute.xlu0 %891 }
 0x242   : > { %1141 = vmatmul.mubr.msk.bf16.vlgmr.msra.gmra.mrb[0].mxu1 %vm583_vm9, %v878_v15 }
 0x315   : > { %v982_v16 = vpop.f32.mrb[0].mxu1 }
 0x316   : > { %v983_v17 = vadd.f32 %v982_v16, %v892_v8  ;;  %v984_v18 = vpop.f32.mrb[1].mxu1 }
 0x317   : > { %v985_v20 = vadd.f32 %v984_v18, %v892_v8  ;;  %v986_v21 = vpop.f32.mrb[2].mxu1 }
 0x318   : > { %v989_v22 = vmax.f32 %v983_v17, 0.0  ;;  %v987_v23 = vpop.f32.mrb[3].mxu1 }
 0x319   : > { %v990_v24 = vmax.f32 %v985_v20, 0.0 }
 0x31a   : > { %991 = vst [vmem:[%s267_s11] sm:$0xff] %v989_v22 }
 0x31b   : > { %992 = vst [vmem:[%s267_s11 + $0x8] sm:$0xff] %v990_v24 }
 0x31c   : > { %1323 = shalt.err (!%p1320_p4)
}
 0x31d   : > { %s1324_s26 = scalar_lea.hbm %s1789_s14, 256  ;;  %s1328_s17 = scalar_lea.hbm %s1839_s6, 512 }
 0x31e   : > { %p1325_p5 = scmp.ne.s32.totalorder %s1789_s14, %s1324_s26  ;;  %p1329_p0 = scmp.lt.u32.totalorder %s1789_s14, %s1839_s6 }
 0x31f   : > { %p1330_p1 = scmp.lt.u32.totalorder %s1328_s17, %s1324_s26  ;;  %p1332_p6 = scmp.lt.u32.totalorder %s1324_s26, %s1789_s14 }
 0x320   : > { %p1326_p8 = pnand %p1325_p5, %p1848_p11 }
 0x321   : > { %p1331_p3 = por %p1330_p1, %p1329_p0 }
 0x322   : > { %p1327_p9 = pneg %p1326_p8 }
 0x323   : > { %p1333_p12 = por %p1332_p6, %p1331_p3 }
 0x325   : > { %p1334_p13 = pnand %p1333_p12, %p1327_p9 }
 0x327   : > { %1337 = shalt.err (!%p1334_p13)
}
 0x328   : > { %1186 = dma.vmem_to_hbm [thread:$0]  (%p1848_p11), %s1791_s28, 256, %s1789_s14, %s994_s25  }
 0x329 PF: > { %s1020_s11 = sand.u32 1, %s1364_s21   ;;  %p1849_p7 = scmp.ne.s32.totalorder %s1844_s10, 0 }
 0x32a   : > { %p1850_p10 = scmp.ge.s32.totalorder %s1376_s24, 2  ;;  %s1021_s29 = scalar_lea.sflag [#allocation6], %s1020_s11 }
 0x32c   : > { %p1193_p2 = pnand %p1850_p10, %p1849_p7 }
 0x32e   : > { %1359 = dma.done.wait (!%p1193_p2), %s1021_s29, 256  }
 0x32f   : > { %1361 = vsyncadd (!%p1193_p2), %s1021_s29, 4294967040  ;;  %p19_p4 = scmp.ge.s32.totalorder %s1449_s27, 4   ;;  %s1851_s21 = smov %s1368_s22 }
 0x330   : > { %s1852_s22 = smov %s1372_s23  ;;  %s1853_s23 = smov %s1461_s30 }
 0x331   : > { %s1854_s24 = smov %s1449_s27  ;;  %21 = sbr.rel (!%p19_p4) target bundleno = 5 (0x5), region = 96 }
 0x338   :  { %1026 = vsyncpa [#allocation5], 1 }
 0x339   :  { %1028 = vsyncpa [#allocation5 + $0x1], 1 }
 0x33a   :  { %1029 = vsyncpa [#allocation6], 1 }
 0x33b   :  { %1031 = vsyncpa [#allocation6 + $0x1], 1 }

</bundles_post_ra>
